<compile_context>
chip_gen: v6e
topology: v6e:2x2x1
jax: 0.10.0
libtpu: 0.0.40
codegen_flags: <defaults>
</compile_context>

<pallas_src>
import jax
import jax.numpy as jnp
from jax.experimental import pallas as pl
from jax.experimental.pallas import tpu as pltpu


def _elu(x):
    # ELU with alpha=1 (PyTorch default): x if x>0 else exp(x)-1
    return jnp.where(x > 0, x, jnp.exp(jnp.minimum(x, 0.0)) - 1.0)


def critic_kernel(
    orient_ref, depth_ref, action_ref,     # (TB,3) (TB,84) (TB,3)  f32
    wa_ref,                                 # (84,128)  bf16: Toeplitz conv -> lanes 0:38
    wb_ref,                                 # (128,128) bf16: rows 64:96 -> w2 (lanes 0:64), rows 0:38 -> w3 (lanes 64:96)
    wact_ref,                               # (128,32)  bf16: wa rows 0:96
    aux128_ref,                             # (8,128)   f32: rows 0:3 w1 (lanes 64:96), row 3 bA, row 4 bB
    aux32_ref,                              # (8,32)    f32: rows 0:3 wa[96:99], row 3 ba, row 4 wv^T, row 5 col 0 bv
    out_ref,                                # (TB,1)    f32
):
    f32 = jnp.float32
    bf16 = jnp.bfloat16

    orient_b = orient_ref[...].astype(bf16)
    depth_b = depth_ref[...].astype(bf16)
    action_b = action_ref[...].astype(bf16)

    aux128 = aux128_ref[...]
    w1_b = aux128[0:3, :].astype(bf16)      # w1 placed in lanes 64:96
    b_a = aux128[3:4, :]
    b_b = aux128[4:5, :]

    aux32 = aux32_ref[...]
    wa_act_b = aux32[0:3, :].astype(bf16)   # wa rows 96:99 (action part)
    b_act = aux32[3:4, :]
    wv_row = aux32[4:5, :]                  # (1,32)
    bv = aux32[5:6, 0:1]                    # (1,1)

    # ---- stage A: ext1 (lanes 0:38) and h1 (lanes 64:96) in one wide ELU ----
    pre_a = (jnp.dot(depth_b, wa_ref[...], preferred_element_type=f32)
             + jnp.dot(orient_b, w1_b, preferred_element_type=f32)
             + b_a)
    h_a = _elu(pre_a)                                            # (TB,128)

    # ---- stage B: cat = [internal | ext2 | 0] directly from one dot ----
    h_b = _elu(jnp.dot(h_a.astype(bf16), wb_ref[...],
                       preferred_element_type=f32) + b_b)        # (TB,128)

    # ---- action head: Linear(99,32) split as (cat@wa[0:96]) + (action@wa[96:99]) ----
    pre = (jnp.dot(h_b.astype(bf16), wact_ref[...], preferred_element_type=f32)
           + jnp.dot(action_b, wa_act_b, preferred_element_type=f32)
           + b_act)
    hidden = _elu(pre)                                           # (TB,32)

    # ---- final Linear(32,1) as VPU multiply + lane reduce ----
    out_ref[...] = jnp.sum(hidden * wv_row, axis=-1, keepdims=True) + bv


def init_params(key):
    ks = jax.random.split(key, 12)
    s = 0.1

    def w(k, shape):
        return jax.random.normal(k, shape, jnp.float32) * s

    return {
        # internal: Linear(3,32), Linear(32,64)   (stored as (in, out))
        "w1": w(ks[0], (3, 32)),   "b1": w(ks[1], (1, 32)),
        "w2": w(ks[2], (32, 64)),  "b2": w(ks[3], (1, 64)),
        # ext1: Conv2d(1,1,(3,3))
        "kconv": w(ks[4], (3, 3)), "bconv": w(ks[5], (1, 1)),
        # ext2: Linear(38,32)
        "w3": w(ks[6], (38, 32)),  "b3": w(ks[7], (1, 32)),
        # action: Linear(99,32), Linear(32,1)
        "wa": w(ks[8], (99, 32)),  "ba": w(ks[9], (1, 32)),
        "wv": w(ks[10], (32, 1)),  "bv": w(ks[11], (1, 1)),
    }


def prep_params(params):
    """One-time parameter packing (hoisted out of the per-call hot path)."""
    f32 = jnp.float32
    bf16 = jnp.bfloat16

    # (84, 38) Toeplitz matrix: depth_flat @ wconv == valid 3x3 conv, flattened
    # in the same row-major order as torch's ext1.reshape(-1, 38).
    kconv = params["kconv"].astype(f32)
    wconv = jnp.zeros((84, 38), f32)
    ocol = jnp.arange(19)
    for orow in range(2):
        for di in range(3):
            for dj in range(3):
                rows = (orow + di) * 21 + dj + ocol      # flat input indices (4,21) row-major
                cols = orow * 19 + ocol                  # flat output indices (2,19) row-major
                wconv = wconv.at[rows, cols].add(kconv[di, dj])

    # Stage A weight: depth (84) -> lanes 0:38 hold the conv output.
    WA = jnp.zeros((84, 128), f32).at[:, :38].set(wconv)

    # Stage B weight: h_a lanes 64:96 (h1) -> internal in lanes 0:64;
    #                 h_a lanes 0:38 (ext1) -> ext2 in lanes 64:96.
    WB = jnp.zeros((128, 128), f32)
    WB = WB.at[64:96, 0:64].set(params["w2"])
    WB = WB.at[0:38, 64:96].set(params["w3"])

    # Action-head weight for the cat part (rows 0:96 of wa); rows 96:128 zero.
    WAct = jnp.zeros((128, 32), f32).at[0:96, :].set(params["wa"][0:96])

    # Small 128-wide aux table: rows 0:3 = w1 into lanes 64:96, row 3 = stage-A bias,
    # row 4 = stage-B bias.
    aux128 = jnp.zeros((8, 128), f32)
    aux128 = aux128.at[0:3, 64:96].set(params["w1"])
    aux128 = aux128.at[3, 0:38].set(jnp.full((38,), params["bconv"][0, 0], f32))
    aux128 = aux128.at[3, 64:96].set(params["b1"][0])
    aux128 = aux128.at[4, 0:64].set(params["b2"][0])
    aux128 = aux128.at[4, 64:96].set(params["b3"][0])

    # Small 32-wide aux table: rows 0:3 = wa[96:99] (action part), row 3 = ba,
    # row 4 = wv^T, row 5 col 0 = bv.
    aux32 = jnp.zeros((8, 32), f32)
    aux32 = aux32.at[0:3, :].set(params["wa"][96:99])
    aux32 = aux32.at[3, :].set(params["ba"][0])
    aux32 = aux32.at[4, :].set(params["wv"][:, 0])
    aux32 = aux32.at[5, 0].set(params["bv"][0, 0])

    return {
        "WA": WA.astype(bf16),
        "WB": WB.astype(bf16),
        "WAct": WAct.astype(bf16),
        "aux128": aux128,
        "aux32": aux32,
    }


_TB_MAX = 2048  # batch rows per grid step (8-aligned; ~12 MiB VMEM incl. pipelining)


@jax.jit
def critic_forward(prepped, orient, depth_map, action):
    # Free (metadata-only) reshapes; inputs stay f32 — no extra HBM cast/pad pass.
    orient2 = orient.reshape(-1, 3)
    depth_flat = depth_map.reshape(-1, 84)      # (B,1,4,21) -> (B,84), row-major
    action2 = action.reshape(-1, 3)
    B = orient2.shape[0]

    # 8-aligned batch tile; ragged last block is clipped by Pallas on writeback.
    tb = B if B < 8 else min(_TB_MAX, (B // 8) * 8)
    grid = (pl.cdiv(B, tb),)

    batch = lambda i: (i, 0)
    const = lambda i: (0, 0)

    in_specs = [
        pl.BlockSpec((tb, 3), batch),        # orient
        pl.BlockSpec((tb, 84), batch),       # depth (flattened)
        pl.BlockSpec((tb, 3), batch),        # action
        pl.BlockSpec((84, 128), const),      # WA    (Toeplitz conv, bf16)
        pl.BlockSpec((128, 128), const),     # WB    (fused w2/w3, bf16)
        pl.BlockSpec((128, 32), const),      # WAct  (wa rows 0:96, bf16)
        pl.BlockSpec((8, 128), const),       # aux128 (w1 + stage biases, f32)
        pl.BlockSpec((8, 32), const),        # aux32  (wa[96:99], ba, wv, bv, f32)
    ]

    out = pl.pallas_call(
        critic_kernel,
        out_shape=jax.ShapeDtypeStruct((B, 1), jnp.float32),
        grid=grid,
        in_specs=in_specs,
        out_specs=pl.BlockSpec((tb, 1), batch),
        compiler_params=pltpu.CompilerParams(
            dimension_semantics=("parallel",),
            vmem_limit_bytes=32 * 1024 * 1024,
        ),
    )(
        orient2, depth_flat, action2,
        prepped["WA"], prepped["WB"], prepped["WAct"],
        prepped["aux128"], prepped["aux32"],
    )
    return out.reshape(-1)


def critic_forward_ref(params, orient, depth_map, action):
    """Pure-JAX f32 reference mirroring the PyTorch forward exactly."""
    orient2 = orient.reshape(-1, 3)
    depth4 = depth_map.reshape(-1, 1, 4, 21)
    action2 = action.reshape(-1, 3)

    h = _elu(orient2 @ params["w1"] + params["b1"])
    internal = _elu(h @ params["w2"] + params["b2"])

    x = depth4[:, 0]                              # (B, 4, 21)
    B = x.shape[0]
    conv = jnp.zeros((B, 2, 19), jnp.float32)
    for di in range(3):
        for dj in range(3):
            conv = conv + x[:, di:di + 2, dj:dj + 19] * params["kconv"][di, dj]
    conv = conv + params["bconv"][0, 0]
    ext1 = _elu(conv).reshape(B, 38)

    ext2 = _elu(ext1 @ params["w3"] + params["b3"])
    cat = jnp.concatenate([internal, ext2, action2], axis=1)
    hidden = _elu(cat @ params["wa"] + params["ba"])
    value = hidden @ params["wv"] + params["bv"]
    return value.reshape(-1)


if __name__ == "__main__":
    key = jax.random.PRNGKey(0)
    kp, k1, k2, k3 = jax.random.split(key, 4)

    params = init_params(kp)
    prepped = prep_params(params)

    B = 8
    orient = jax.random.normal(k1, (B, 3), jnp.float32)
    depth_map = jax.random.normal(k2, (B, 1, 4, 21), jnp.float32)
    action = jax.random.normal(k3, (B, 3), jnp.float32)

    out = critic_forward(prepped, orient, depth_map, action)
    out = jax.block_until_ready(out)

    ref = critic_forward_ref(params, orient, depth_map, action)
    assert out.shape == (B,)
    # Tolerance accounts for the bf16 MXU dots (weights/activations quantized to bf16
    # inside the kernel); structural bugs would be orders of magnitude larger.
    assert jnp.allclose(out, ref, rtol=2e-2, atol=2e-2), (out, ref)

    print("KERNEL_OK")
</pallas_src>

<mosaic_0001>
module attributes {stable_mosaic.version = 11 : i64} {
  func.func @critic_kernel(%arg0: i32, %arg1: memref<8x3xf32, #tpu.memory_space<vmem>>, %arg2: memref<8x84xf32, #tpu.memory_space<vmem>>, %arg3: memref<8x3xf32, #tpu.memory_space<vmem>>, %arg4: memref<84x128xbf16, #tpu.memory_space<vmem>>, %arg5: memref<128x128xbf16, #tpu.memory_space<vmem>>, %arg6: memref<128x32xbf16, #tpu.memory_space<vmem>>, %arg7: memref<8x128xf32, #tpu.memory_space<vmem>>, %arg8: memref<8x32xf32, #tpu.memory_space<vmem>>, %arg9: memref<8x1xf32, #tpu.memory_space<vmem>>) attributes {dimension_semantics = [#tpu.dimension_semantics<parallel>], iteration_bounds = array<i64: 1>, scalar_prefetch = 0 : i64, scratch_operands = 0 : i64, tpu.core_type = #tpu.core_type<tc>, window_params = [{transform_indices = @transform_0, window_bounds = array<i64: 8, 3>}, {transform_indices = @transform_1, window_bounds = array<i64: 8, 84>}, {transform_indices = @transform_2, window_bounds = array<i64: 8, 3>}, {pipeline_mode = #tpu.pipeline_mode<synchronous>, transform_indices = @transform_3, window_bounds = array<i64: 84, 128>}, {pipeline_mode = #tpu.pipeline_mode<synchronous>, transform_indices = @transform_4, window_bounds = array<i64: 128, 128>}, {pipeline_mode = #tpu.pipeline_mode<synchronous>, transform_indices = @transform_5, window_bounds = array<i64: 128, 32>}, {pipeline_mode = #tpu.pipeline_mode<synchronous>, transform_indices = @transform_6, window_bounds = array<i64: 8, 128>}, {pipeline_mode = #tpu.pipeline_mode<synchronous>, transform_indices = @transform_7, window_bounds = array<i64: 8, 32>}, {transform_indices = @transform_8, window_bounds = array<i64: 8, 1>}]} {
    %c0 = arith.constant 0 : index
    %c0_0 = arith.constant 0 : index
    %0 = vector.load %arg1[%c0, %c0_0] : memref<8x3xf32, #tpu.memory_space<vmem>>, vector<8x3xf32>
    %1 = arith.truncf %0 : vector<8x3xf32> to vector<8x3xbf16>
    %c0_1 = arith.constant 0 : index
    %c0_2 = arith.constant 0 : index
    %2 = vector.load %arg2[%c0_1, %c0_2] : memref<8x84xf32, #tpu.memory_space<vmem>>, vector<8x84xf32>
    %3 = arith.truncf %2 : vector<8x84xf32> to vector<8x84xbf16>
    %c0_3 = arith.constant 0 : index
    %c0_4 = arith.constant 0 : index
    %4 = vector.load %arg3[%c0_3, %c0_4] : memref<8x3xf32, #tpu.memory_space<vmem>>, vector<8x3xf32>
    %5 = arith.truncf %4 : vector<8x3xf32> to vector<8x3xbf16>
    %c0_5 = arith.constant 0 : index
    %c0_6 = arith.constant 0 : index
    %6 = vector.load %arg7[%c0_5, %c0_6] : memref<8x128xf32, #tpu.memory_space<vmem>>, vector<8x128xf32>
    %7 = vector.extract_strided_slice %6 {offsets = [0, 0], sizes = [3, 128], strides = [1, 1]} : vector<8x128xf32> to vector<3x128xf32>
    %8 = arith.truncf %7 : vector<3x128xf32> to vector<3x128xbf16>
    %9 = vector.extract_strided_slice %6 {offsets = [3, 0], sizes = [1, 128], strides = [1, 1]} : vector<8x128xf32> to vector<1x128xf32>
    %10 = vector.extract_strided_slice %6 {offsets = [4, 0], sizes = [1, 128], strides = [1, 1]} : vector<8x128xf32> to vector<1x128xf32>
    %c0_7 = arith.constant 0 : index
    %c0_8 = arith.constant 0 : index
    %11 = vector.load %arg8[%c0_7, %c0_8] : memref<8x32xf32, #tpu.memory_space<vmem>>, vector<8x32xf32>
    %12 = vector.extract_strided_slice %11 {offsets = [0, 0], sizes = [3, 32], strides = [1, 1]} : vector<8x32xf32> to vector<3x32xf32>
    %13 = arith.truncf %12 : vector<3x32xf32> to vector<3x32xbf16>
    %14 = vector.extract_strided_slice %11 {offsets = [3, 0], sizes = [1, 32], strides = [1, 1]} : vector<8x32xf32> to vector<1x32xf32>
    %15 = vector.extract_strided_slice %11 {offsets = [4, 0], sizes = [1, 32], strides = [1, 1]} : vector<8x32xf32> to vector<1x32xf32>
    %16 = vector.extract_strided_slice %11 {offsets = [5, 0], sizes = [1, 1], strides = [1, 1]} : vector<8x32xf32> to vector<1x1xf32>
    %c0_9 = arith.constant 0 : index
    %c0_10 = arith.constant 0 : index
    %17 = vector.load %arg4[%c0_9, %c0_10] : memref<84x128xbf16, #tpu.memory_space<vmem>>, vector<84x128xbf16>
    %cst = arith.constant dense<0.000000e+00> : vector<8x128xf32>
    %18 = tpu.matmul %3, %17, %cst {dimension_numbers = #tpu.dot_dimension_numbers<[1], [0], [0], [1], [0, 0, 1, 1], [], []>} : vector<8x84xbf16>, vector<84x128xbf16>, vector<8x128xf32> -> vector<8x128xf32>
    %cst_11 = arith.constant dense<0.000000e+00> : vector<8x128xf32>
    %19 = tpu.matmul %1, %8, %cst_11 {dimension_numbers = #tpu.dot_dimension_numbers<[1], [0], [0], [1], [0, 0, 1, 1], [], []>} : vector<8x3xbf16>, vector<3x128xbf16>, vector<8x128xf32> -> vector<8x128xf32>
    %20 = arith.addf %18, %19 : vector<8x128xf32>
    %21 = vector.broadcast %9 : vector<1x128xf32> to vector<8x128xf32>
    %22 = arith.addf %20, %21 : vector<8x128xf32>
    %cst_12 = arith.constant 0.000000e+00 : f32
    %23 = vector.broadcast %cst_12 : f32 to vector<8x128xf32>
    %24 = arith.cmpf ogt, %22, %23 : vector<8x128xf32>
    %cst_13 = arith.constant 0.000000e+00 : f32
    %25 = vector.broadcast %cst_13 : f32 to vector<8x128xf32>
    %26 = arith.minimumf %22, %25 : vector<8x128xf32>
    %27 = math.exp %26 : vector<8x128xf32>
    %cst_14 = arith.constant 1.000000e+00 : f32
    %28 = vector.broadcast %cst_14 : f32 to vector<8x128xf32>
    %29 = arith.subf %27, %28 : vector<8x128xf32>
    %30 = arith.select %24, %22, %29 : vector<8x128xi1>, vector<8x128xf32>
    %31 = arith.truncf %30 : vector<8x128xf32> to vector<8x128xbf16>
    %c0_15 = arith.constant 0 : index
    %c0_16 = arith.constant 0 : index
    %32 = vector.load %arg5[%c0_15, %c0_16] : memref<128x128xbf16, #tpu.memory_space<vmem>>, vector<128x128xbf16>
    %cst_17 = arith.constant dense<0.000000e+00> : vector<8x128xf32>
    %33 = tpu.matmul %31, %32, %cst_17 {dimension_numbers = #tpu.dot_dimension_numbers<[1], [0], [0], [1], [0, 0, 1, 1], [], []>} : vector<8x128xbf16>, vector<128x128xbf16>, vector<8x128xf32> -> vector<8x128xf32>
    %34 = vector.broadcast %10 : vector<1x128xf32> to vector<8x128xf32>
    %35 = arith.addf %33, %34 : vector<8x128xf32>
    %cst_18 = arith.constant 0.000000e+00 : f32
    %36 = vector.broadcast %cst_18 : f32 to vector<8x128xf32>
    %37 = arith.cmpf ogt, %35, %36 : vector<8x128xf32>
    %cst_19 = arith.constant 0.000000e+00 : f32
    %38 = vector.broadcast %cst_19 : f32 to vector<8x128xf32>
    %39 = arith.minimumf %35, %38 : vector<8x128xf32>
    %40 = math.exp %39 : vector<8x128xf32>
    %cst_20 = arith.constant 1.000000e+00 : f32
    %41 = vector.broadcast %cst_20 : f32 to vector<8x128xf32>
    %42 = arith.subf %40, %41 : vector<8x128xf32>
    %43 = arith.select %37, %35, %42 : vector<8x128xi1>, vector<8x128xf32>
    %44 = arith.truncf %43 : vector<8x128xf32> to vector<8x128xbf16>
    %c0_21 = arith.constant 0 : index
    %c0_22 = arith.constant 0 : index
    %45 = vector.load %arg6[%c0_21, %c0_22] : memref<128x32xbf16, #tpu.memory_space<vmem>>, vector<128x32xbf16>
    %cst_23 = arith.constant dense<0.000000e+00> : vector<8x32xf32>
    %46 = tpu.matmul %44, %45, %cst_23 {dimension_numbers = #tpu.dot_dimension_numbers<[1], [0], [0], [1], [0, 0, 1, 1], [], []>} : vector<8x128xbf16>, vector<128x32xbf16>, vector<8x32xf32> -> vector<8x32xf32>
    %cst_24 = arith.constant dense<0.000000e+00> : vector<8x32xf32>
    %47 = tpu.matmul %5, %13, %cst_24 {dimension_numbers = #tpu.dot_dimension_numbers<[1], [0], [0], [1], [0, 0, 1, 1], [], []>} : vector<8x3xbf16>, vector<3x32xbf16>, vector<8x32xf32> -> vector<8x32xf32>
    %48 = arith.addf %46, %47 : vector<8x32xf32>
    %49 = vector.broadcast %14 : vector<1x32xf32> to vector<8x32xf32>
    %50 = arith.addf %48, %49 : vector<8x32xf32>
    %cst_25 = arith.constant 0.000000e+00 : f32
    %51 = vector.broadcast %cst_25 : f32 to vector<8x32xf32>
    %52 = arith.cmpf ogt, %50, %51 : vector<8x32xf32>
    %cst_26 = arith.constant 0.000000e+00 : f32
    %53 = vector.broadcast %cst_26 : f32 to vector<8x32xf32>
    %54 = arith.minimumf %50, %53 : vector<8x32xf32>
    %55 = math.exp %54 : vector<8x32xf32>
    %cst_27 = arith.constant 1.000000e+00 : f32
    %56 = vector.broadcast %cst_27 : f32 to vector<8x32xf32>
    %57 = arith.subf %55, %56 : vector<8x32xf32>
    %58 = arith.select %52, %50, %57 : vector<8x32xi1>, vector<8x32xf32>
    %59 = vector.broadcast %15 : vector<1x32xf32> to vector<8x32xf32>
    %60 = arith.mulf %58, %59 : vector<8x32xf32>
    %cst_28 = arith.constant dense<0.000000e+00> : vector<8xf32>
    %61 = vector.multi_reduction <add>, %60, %cst_28 [1] : vector<8x32xf32> to vector<8xf32>
    %62 = vector.shape_cast %61 : vector<8xf32> to vector<8x1xf32>
    %63 = vector.broadcast %16 : vector<1x1xf32> to vector<8x1xf32>
    %64 = arith.addf %62, %63 : vector<8x1xf32>
    %c0_29 = arith.constant 0 : index
    %c0_30 = arith.constant 0 : index
    %65 = vector.load %arg9[%c0_29, %c0_30] : memref<8x1xf32, #tpu.memory_space<vmem>>, vector<8x1xf32>
    tpu.vector_store %arg9[%c0_29, %c0_30], %64 {strides = array<i32>} : memref<8x1xf32, #tpu.memory_space<vmem>>, vector<8x1xf32>,
    return
  }
  func.func @transform_0(%arg0: i32) -> (i32, i32) {
    %c0_i32 = arith.constant 0 : i32
    %c0_i32_0 = arith.constant 0 : i32
    return %arg0, %c0_i32 : i32, i32
  }
  func.func @transform_1(%arg0: i32) -> (i32, i32) {
    %c0_i32 = arith.constant 0 : i32
    %c0_i32_0 = arith.constant 0 : i32
    return %arg0, %c0_i32 : i32, i32
  }
  func.func @transform_2(%arg0: i32) -> (i32, i32) {
    %c0_i32 = arith.constant 0 : i32
    %c0_i32_0 = arith.constant 0 : i32
    return %arg0, %c0_i32 : i32, i32
  }
  func.func @transform_3(%arg0: i32) -> (i32, i32) {
    %c0_i32 = arith.constant 0 : i32
    %c0_i32_0 = arith.constant 0 : i32
    %c0_i32_1 = arith.constant 0 : i32
    return %c0_i32, %c0_i32_0 : i32, i32
  }
  func.func @transform_4(%arg0: i32) -> (i32, i32) {
    %c0_i32 = arith.constant 0 : i32
    %c0_i32_0 = arith.constant 0 : i32
    %c0_i32_1 = arith.constant 0 : i32
    return %c0_i32, %c0_i32_0 : i32, i32
  }
  func.func @transform_5(%arg0: i32) -> (i32, i32) {
    %c0_i32 = arith.constant 0 : i32
    %c0_i32_0 = arith.constant 0 : i32
    %c0_i32_1 = arith.constant 0 : i32
    return %c0_i32, %c0_i32_0 : i32, i32
  }
  func.func @transform_6(%arg0: i32) -> (i32, i32) {
    %c0_i32 = arith.constant 0 : i32
    %c0_i32_0 = arith.constant 0 : i32
    %c0_i32_1 = arith.constant 0 : i32
    return %c0_i32, %c0_i32_0 : i32, i32
  }
  func.func @transform_7(%arg0: i32) -> (i32, i32) {
    %c0_i32 = arith.constant 0 : i32
    %c0_i32_0 = arith.constant 0 : i32
    %c0_i32_1 = arith.constant 0 : i32
    return %c0_i32, %c0_i32_0 : i32, i32
  }
  func.func @transform_8(%arg0: i32) -> (i32, i32) {
    %c0_i32 = arith.constant 0 : i32
    %c0_i32_0 = arith.constant 0 : i32
    return %arg0, %c0_i32 : i32, i32
  }
}

</mosaic_0001>

<bundles_post_ra>
// kernel: critic_forward.1
= control target key start
LH: loop header
LB: loop body
LE: loop exit
PB: predicated region body
PF: predicated region fallthrough
CT: control target
= control target key end

     0   :  { %vm56_vm0 = vcmask 1041408   ;;  %vm55_vm1 = vcmask 1040384   ;;  %v646_v0 = vmov 0.0   ;;  %v647_v5 = vmov 65535   ;;  %s842_s3 = inlined_call_operand.vmem [shape: bf16[84,128], index: 3, kind: input, shape index: {}]   ;;  %s843_s6 = inlined_call_operand.vmem [shape: f32[8,128], index: 6, kind: input, shape index: {}]   ;;  %s844_s0 = inlined_call_operand.vmem [shape: f32[8,3], index: 0, kind: input, shape index: {}]   ;;  %s845_s1 = inlined_call_operand.vmem [shape: f32[8,84], index: 1, kind: input, shape index: {}]   ;;  %s846_s4 = inlined_call_operand.vmem [shape: bf16[128,128], index: 4, kind: input, shape index: {}]   ;;  %s847_s5 = inlined_call_operand.vmem [shape: bf16[128,32], index: 5, kind: input, shape index: {}]   ;;  %s848_s7 = inlined_call_operand.vmem [shape: f32[8,32], index: 7, kind: input, shape index: {}]   ;;  %s849_s2 = inlined_call_operand.vmem [shape: f32[8,3], index: 2, kind: input, shape index: {}]   ;;  %s850_s8 = inlined_call_operand.vmem [shape: f32[8,1], index: 8, kind: output, shape index: {}]  }
   0x1   :  { %553 = vmatprep.subr.bf16.mxu1 %v646_v0  ;;  %v618_v1 = vld [vmem:[%s842_s3 + $0x28] ss:$0 sps:$4 sm:$0x33]   ;;  %547 = vmatprep.subr.bf16.mxu0 %v646_v0  ;;  %v619_v3 = vld [vmem:[%s842_s3 + $0x20] sm:$0xff]   ;;  %v57_v6 = vsel %vm55_vm1, 4294967295, %v647_v5  ;;  %vm648_vm2 = vmmov 0   ;;  %v182_v30 = vlaneseq }
   0x2   :  { %v140_v2 = vsel %vm56_vm0, %v618_v1, 0  ;;  %v706_v4 = vld [vmem:[%s843_s6] sm:$0xff]  ;;  %v712_v8 = vsel %vm56_vm0, %v57_v6, 0  ;;  %549 = vmatprep.mubr.msk.bf16.mxu0 %vm648_vm2, %v646_v0  ;;  %565 = vmatprep.mubr.msk.bf16.mxu1 %vm648_vm2, %v646_v0  ;;  %v620_v11 = vld [vmem:[%s842_s3 + $0x18] sm:$0xff]   ;;  %vm51_vm3 = vcmask 23552   ;;  %v621_v13 = vld [vmem:[%s842_s3 + $0x10] sm:$0xff]  }
   0x3   :  { %554 = vmatpush3.bf16.msra.mxu1 %v140_v2  ;;  %v37_v7 = vpack.c.bf16 %v706_v4, %v706_v4  ;;  %v30_v9 = vld [vmem:[%s844_s0] sm:$0xff]  ;;  %v622_v14 = vld [vmem:[%s842_s3 + $0x8] sm:$0xff]   ;;  %vm135_vm4 = vcmask 687104   ;;  %v624_v18 = vld [vmem:[%s846_s4 + $0x38] sm:$0xff]   ;;  %v788_v33 = vshrl.u32 %v182_v30, 7  ;;  %vm475_vm8 = vcmask 261120  }
   0x4   :  { %555 = vmatprep.subr.bf16.mxu1 %v646_v0  ;;  %v31_v12 = vpack.c.bf16 %v30_v9, %v30_v9  ;;  %v623_v15 = vld [vmem:[%s842_s3] sm:$0xff]   ;;  %v625_v19 = vld [vmem:[%s846_s4 + $0x30] sm:$0xff]   ;;  %v626_v20 = vld [vmem:[%s846_s4 + $0x28] sm:$0xff]   ;;  %vm484_vm9 = vcmask 7168  }
   0x5   :  { %v60_v10 = vand.u32 %v712_v8, %v37_v7  ;;  %v32_v16 = vld [vmem:[%s845_s1] sm:$0xff]  ;;  %v628_v22 = vld [vmem:[%s846_s4 + $0x18] sm:$0xff]   ;;  %v629_v23 = vld [vmem:[%s846_s4 + $0x10] sm:$0xff]   ;;  %v184_v34 = vsub.s32 3, %v788_v33  ;;  %v212_v59 = vsub.s32 4, %v788_v33 }
   0x6   :  { %v33_v17 = vpack.c.bf16 %v32_v16, %v32_v16  ;;  %v627_v21 = vld [vmem:[%s846_s4 + $0x20] sm:$0xff]   ;;  %v630_v24 = vld [vmem:[%s846_s4 + $0x8] sm:$0xff]   ;;  %v632_v26 = vld [vmem:[%s847_s5 + $0x38] sm:$0xff]  }
   0x7   :  { %556 = vmatpush3.bf16.msra.mxu1 %v619_v3  ;;  %548 = vmatpush3.bf16.msra.mxu0 %v60_v10  ;;  %v631_v25 = vld [vmem:[%s846_s4] sm:$0xff]   ;;  %v633_v27 = vld [vmem:[%s847_s5 + $0x30] sm:$0xff]   ;;  %v185_v35 = vrot.slane %v706_v4, %v184_v34  ;;  %v634_v51 = vld [vmem:[%s847_s5 + $0x28] sm:$0xff]   ;;  %v213_v60 = vrot.slane %v706_v4, %v212_v59 }
   0x8   :  { %557 = vmatprep.subr.bf16.mxu1 %v646_v0  ;;  %569 = vmatprep.subr.bf16.mxu0 %v646_v0  ;;  %v797_v44 = vld [vmem:[%s848_s7] sm:$0xff]  ;;  %v636_v53 = vld [vmem:[%s847_s5 + $0x18] sm:$0xff]   ;;  %v637_v54 = vld [vmem:[%s847_s5 + $0x10] sm:$0xff]  }
   0x9   :  { %v39_v45 = vpack.c.bf16 %v797_v44, %v797_v44  ;;  %v635_v52 = vld [vmem:[%s847_s5 + $0x20] sm:$0xff]   ;;  %v638_v55 = vld [vmem:[%s847_s5 + $0x8] sm:$0xff]   ;;  %v462_v4 = vrot.slane %v797_v44, %v184_v34 }
   0xa   :  { %550 = vmatmul.mubr.msk.bf16.vlgmr.msra.gmra.mxu0 %vm51_vm3, %v31_v12  ;;  %v34_v56 = vld [vmem:[%s849_s2] sm:$0xff] }
   0xb   :  { %558 = vmatpush3.bf16.msra.mxu1 %v620_v11  ;;  %585 = vmatprep.mubr.msk.bf16.mxu0 %vm648_vm2, %v646_v0  ;;  %v329_v48 = vand.u32 %v712_v8, %v39_v45  ;;  %v35_v57 = vpack.c.bf16 %v34_v56, %v34_v56  ;;  %v639_v58 = vld [vmem:[%s847_s5] sm:$0xff]  }
   0xc   :  { %559 = vmatprep.subr.bf16.mxu1 %v646_v0  ;;  %570 = vmatpush3.bf16.msra.mxu0 %v624_v18 }
   0xd   :  { %571 = vmatprep.subr.bf16.mxu0 %v646_v0 }
   0xf   :  { %560 = vmatpush3.bf16.msra.mxu1 %v621_v13 }
  0x10   :  { %561 = vmatprep.subr.bf16.mxu1 %v646_v0  ;;  %572 = vmatpush3.bf16.msra.mxu0 %v625_v19 }
  0x11   :  { %573 = vmatprep.subr.bf16.mxu0 %v646_v0 }
  0x13   :  { %562 = vmatpush3.bf16.msra.mxu1 %v622_v14 }
  0x14   :  { %563 = vmatprep.subr.bf16.mxu1 %v646_v0  ;;  %574 = vmatpush3.bf16.msra.mxu0 %v626_v20 }
  0x15   :  { %575 = vmatprep.subr.bf16.mxu0 %v646_v0 }
  0x17   :  { %564 = vmatpush3.bf16.msra.mxu1 %v623_v15 }
  0x18   :  { %595 = vmatprep.subr.bf16.mxu1 %v646_v0  ;;  %576 = vmatpush3.bf16.msra.mxu0 %v627_v21 }
  0x19   :  { %577 = vmatprep.subr.bf16.mxu0 %v646_v0 }
  0x1a   :  { %566 = vmatmul.mubr.msk.bf16.vlgmr.msra.gmra.mxu1 %vm135_vm4, %v33_v17 }
  0x1b   :  { %611 = vmatprep.mubr.msk.bf16.mxu1 %vm648_vm2, %v646_v0  ;;  %596 = vmatpush3.bf16.msra.mxu1 %v632_v26 }
  0x1c   :  { %578 = vmatpush3.bf16.msra.mxu0 %v628_v22  ;;  %597 = vmatprep.subr.bf16.mxu1 %v646_v0  ;;  %v473_v22 = vrot.slane %v797_v44, %v212_v59 }
  0x1d   :  { %579 = vmatprep.subr.bf16.mxu0 %v646_v0 }
  0x1f   :  { %598 = vmatpush3.bf16.msra.mxu1 %v633_v27  ;;  %v481_v27 = vsub.s32 5, %v788_v33 }
  0x20   :  { %580 = vmatpush3.bf16.msra.mxu0 %v629_v23  ;;  %599 = vmatprep.subr.bf16.mxu1 %v646_v0 }
  0x21   :  { %581 = vmatprep.subr.bf16.mxu0 %v646_v0 }
  0x23   :  { %600 = vmatpush3.bf16.msra.mxu1 %v634_v51 }
  0x24   :  { %582 = vmatpush3.bf16.msra.mxu0 %v630_v24  ;;  %601 = vmatprep.subr.bf16.mxu1 %v646_v0 }
  0x25   :  { %583 = vmatprep.subr.bf16.mxu0 %v646_v0 }
  0x27   :  { %602 = vmatpush3.bf16.msra.mxu1 %v635_v52 }
  0x28   :  { %584 = vmatpush3.bf16.msra.mxu0 %v631_v25  ;;  %603 = vmatprep.subr.bf16.mxu1 %v646_v0 }
  0x29   :  { %589 = vmatprep.subr.bf16.mxu0 %v646_v0 }
  0x2b   :  { %604 = vmatpush3.bf16.msra.mxu1 %v636_v53 }
  0x2c   :  { %605 = vmatprep.subr.bf16.mxu1 %v646_v0 }
  0x2f   :  { %606 = vmatpush3.bf16.msra.mxu1 %v637_v54 }
  0x30   :  { %607 = vmatprep.subr.bf16.mxu1 %v646_v0 }
  0x33   :  { %608 = vmatpush3.bf16.msra.mxu1 %v638_v55 }
  0x34   :  { %609 = vmatprep.subr.bf16.mxu1 %v646_v0 }
  0x37   :  { %610 = vmatpush3.bf16.msra.mxu1 %v639_v58 }
  0xca   :  { %v96_v28 = vpop.f32.mrf.mxu0 }
  0xcc   :  { %v551_v29 = vpop.f32.mrf.mxu0 }
  0xce   :  { %v99_v31 = vpop.f32.mrf.mxu0 }
  0xd0   :  { %v552_v32 = vpop.f32.mrf.mxu0 }
  0xda   :  { %v176_v36 = vpop.f32.mrf.mxu1 }
  0xdb   :  { %v177_v37 = vadd.f32 %v176_v36, %v96_v28  ;;  %v482_v28 = vrot.slane %v797_v44, %v481_v27 }
  0xdc   :  { %v567_v38 = vpop.f32.mrf.mxu1 }
  0xdd   :  { %v186_v39 = vadd.f32 %v185_v35, %v177_v37 }
  0xde   :  { %v179_v40 = vpop.f32.mrf.mxu1 }
  0xdf   :  { %v188_v41 = vmin.f32 %v186_v39, 0.0  ;;  %vm187_vm5 = vcmp.gt.f32.partialorder %v186_v39, 0.0 }
  0xe0   :  { %v568_v42 = vpop.f32.mrf.mxu1 }
  0xe1   :  { %v189_v43 = vmul.f32 1.442695, %v188_v41 }
  0xe3   :  { %640 = vpow2.f32 %v189_v43 }
  0xf0   :  { %v641_v46 = vpop.eup %640 }
  0xf1   :  { %v498_v47 = vadd.f32 -1.0, %v641_v46 }
  0xf3   :  { %v192_v49 = vsel %vm187_vm5, %v186_v39, %v498_v47 }
  0xf4   :  { %v193_v50 = vpack.c.bf16 %v192_v49, %v192_v49 }
  0xf6   :  { %586 = vmatmul.mubr.bf16.vlgmr.msra.gmra.mxu0 %v193_v50 }
  0xf7   :  { %590 = vmatpush3.bf16.msra.mxu0 %v329_v48  ;;  %591 = vmatprep.mubr.msk.bf16.mxu0 %vm648_vm2, %v646_v0 }
  0xfe   :  { %592 = vmatmul.mubr.msk.bf16.vlgmr.msra.gmra.mxu0 %vm51_vm3, %v35_v57 }
 0x1b6   :  { %v296_v61 = vpop.f32.mrf.mxu0 }
 0x1b7   :  { %v297_v62 = vadd.f32 %v296_v61, %v213_v60 }
 0x1b8   :  { %v587_v63 = vpop.f32.mrf.mxu0 }
 0x1b9   :  { %v303_v1 = vmin.f32 %v297_v62, 0.0  ;;  %vm302_vm6 = vcmp.gt.f32.partialorder %v297_v62, 0.0 }
 0x1ba   :  { %v299_v2 = vpop.f32.mrf.mxu0 }
 0x1bb   :  { %v304_v3 = vmul.f32 1.442695, %v303_v1 }
 0x1bc   :  { %v588_v5 = vpop.f32.mrf.mxu0 }
 0x1bd   :  { %642 = vpow2.f32 %v304_v3 }
 0x1be   :  { %v365_v9 = vpop.f32.mrf.mxu0 }
 0x1c0   :  { %v593_v10 = vpop.f32.mrf.mxu0 }
 0x1c2   :  { %v368_v11 = vpop.f32.mrf.mxu0 }
 0x1c4   :  { %v594_v12 = vpop.f32.mrf.mxu0 }
 0x1ca   :  { %v643_v6 = vpop.eup %642 }
 0x1cb   :  { %v507_v7 = vadd.f32 -1.0, %v643_v6 }
 0x1cd   :  { %v307_v0 = vsel %vm302_vm6, %v297_v62, %v507_v7 }
 0x1ce   :  { %v308_v8 = vpack.c.bf16 %v307_v0, %v307_v0 }
 0x1d0   :  { %612 = vmatmul.mubr.bf16.vlgmr.msra.gmra.mxu1 %v308_v8 }
 0x290   :  { %v453_v13 = vpop.f32.mrf.mxu1 }
 0x291   :  { %v454_v14 = vadd.f32 %v453_v13, %v365_v9 }
 0x292   :  { %v613_v15 = vpop.f32.mrf.mxu1 }
 0x293   :  { %v463_v16 = vadd.f32 %v462_v4, %v454_v14 }
 0x294   :  { %v456_v17 = vpop.f32.mrf.mxu1 }
 0x295   :  { %v465_v18 = vmin.f32 %v463_v16, 0.0  ;;  %vm464_vm7 = vcmp.gt.f32.partialorder %v463_v16, 0.0 }
 0x296   :  { %v614_v19 = vpop.f32.mrf.mxu1 }
 0x297   :  { %v466_v20 = vmul.f32 1.442695, %v465_v18 }
 0x299   :  { %644 = vpow2.f32 %v466_v20 }
 0x2a6   :  { %v645_v21 = vpop.eup %644 }
 0x2a7   :  { %v517_v23 = vadd.f32 -1.0, %v645_v21 }
 0x2a9   :  { %v469_v24 = vsel %vm464_vm7, %v463_v16, %v517_v23 }
 0x2aa   :  { %v474_v25 = vmul.f32 %v473_v22, %v469_v24 }
 0x2ac   :  { %v476_v26 = vsel %vm475_vm8, %v474_v25, 0.0 }
 0x2ad   :  { %477 = vadd.xlane.f32.xlu0 %v476_v26 }
 0x336   :  { %v478_v29 = vpop.xlane.xlu0 %477 }
 0x337   :  { %v483_v30 = vadd.f32 %v482_v28, %v478_v29 }
 0x339   :  { %485 = vst.msk [vmem:[%s850_s8] sm:$0xff] %vm484_vm9, %v483_v30 }

</bundles_post_ra>
